<compile_context>
chip_gen: v7x
topology: tpu7x:2x2x1
jax: 0.10.0
libtpu: 0.0.40
codegen_flags: <defaults>
</compile_context>

<pallas_src>
import math
import functools

import jax
import jax.numpy as jnp
import numpy as np
from jax import lax
from jax.experimental import pallas as pl
from jax.experimental.pallas import tpu as pltpu

NEG_BIG = float(-(2 ** 63))   # -sys.maxsize - 1, as in the PyTorch reference
LANE = 128


def _layernorm(x, gamma, beta, eps=1e-5):
    mu = jnp.mean(x, axis=-1, keepdims=True)
    var = jnp.mean((x - mu) ** 2, axis=-1, keepdims=True)
    return (x - mu) * lax.rsqrt(var + eps) * gamma + beta


def _gelu_exact(x):
    return 0.5 * x * (1.0 + lax.erf(x * (1.0 / math.sqrt(2.0))))


def _vmem_capacity_bytes():
    try:
        return int(pltpu.get_tpu_info().vmem_capacity_bytes)
    except Exception:
        return 64 << 20      # conservative (v7x-sized) default


def _const_index_map(*args, ndim):
    return (0,) * ndim


def _pick_row_tile(rows):
    for cand in (1024, 512, 256, 128):
        if rows % cand == 0:
            return cand
    return rows


def _pick_col_tile(cols):
    for cand in (1024, 768, 512, 384, 256, 128):
        if cols % cand == 0:
            return cand
    return cols          # full width (small models)


def _pick_head_chunk(H, TQ, Sp, d_k, sc_bytes, budget):
    """Largest divisor of H whose per-step attention working set fits the budget."""
    best = 1
    for hc in range(1, H + 1):
        if H % hc:
            continue
        est = (3 * hc * TQ * Sp * 4              # f32 logits / exp / probs intermediates
               + 2 * 2 * hc * Sp * d_k * 2       # K + V blocks (bf16, double-buffered)
               + 2 * hc * TQ * Sp * sc_bytes     # scores output block (double-buffered)
               + 2 * 2 * hc * TQ * d_k)          # Q block (bf16, double-buffered)
        if est <= budget:
            best = hc
    return best


# ---------------------------------------------------------------------------
# Kernel 1: fused QKV projection.  (row-tile, E) @ (E, N-tile) + bias, bf16 MXU.
# ---------------------------------------------------------------------------
def _qkv_proj_kernel(x_ref, w_ref, b_ref, o_ref):
    acc = jnp.dot(x_ref[...], w_ref[...], preferred_element_type=jnp.float32)
    o_ref[...] = (acc + b_ref[...]).astype(o_ref.dtype)


# ---------------------------------------------------------------------------
# Kernel 2: attention (head-chunked) + output proj + FFN + 2x LayerNorm.
# Grid: (batch, query-tile, head-chunk); head-chunk is the (fast) reduction axis.
# ---------------------------------------------------------------------------
def _attn_ffn_kernel(scale,
                     q_ref, k_ref, v_ref, x_ref, m_ref,
                     woh_ref, bo_ref, w1_ref, b1_ref, w2_ref, b2_ref,
                     g1_ref, be1_ref, g2_ref, be2_ref,
                     out_ref, sc_ref, acc_ref):
    hc = pl.program_id(2)

    @pl.when(hc == 0)
    def _():
        acc_ref[...] = jnp.zeros_like(acc_ref)

    q = q_ref[0] * scale          # (HC, TQ, d_k) bf16; 1/sqrt(S) folded into Q
    k = k_ref[0]                  # (HC, Sp, d_k) bf16
    v = v_ref[0]                  # (HC, Sp, d_k) bf16
    m = m_ref[0]                  # (1, Sp)      f32 mask over keys (1=keep, 0=mask)

    # additive mask, pre-scaled once (reference: (r + mask) / sqrt(S)), f32 math
    inv_mask = 1.0 - m
    add_mask = jnp.where(inv_mask == 1.0, NEG_BIG, inv_mask) * scale    # (1, Sp)

    # ---- attention for this head chunk (bf16 MXU, f32 accumulate) ----
    r = jnp.einsum('hqd,hkd->hqk', q, k,
                   preferred_element_type=jnp.float32)                  # (HC, TQ, Sp)
    r = r + add_mask[None]
    r = r - jnp.max(r, axis=-1, keepdims=True)
    e = jnp.exp(r)
    attn = e * pl.reciprocal(jnp.sum(e, axis=-1, keepdims=True), approx=True)
    sc_ref[0] = attn.astype(sc_ref.dtype)                               # lane-dense store

    blended = jnp.einsum('hqk,hkd->hqd', attn.astype(v.dtype), v,
                         preferred_element_type=jnp.float32)            # (HC, TQ, d_k)

    # per-head output projection, accumulated over head chunks in f32 scratch
    proj = jnp.einsum('hqd,hde->hqe', blended.astype(woh_ref.dtype), woh_ref[...],
                      preferred_element_type=jnp.float32)               # (HC, TQ, E)
    acc_ref[...] += jnp.sum(proj, axis=0)

    # ---- merge + residual + norm1 + FFN + residual + norm2, once per query tile ----
    @pl.when(hc == pl.num_programs(2) - 1)
    def _():
        attn_out = acc_ref[...] + bo_ref[...]
        x1 = _layernorm(attn_out + x_ref[0], g1_ref[...], be1_ref[...])
        h1 = jnp.dot(x1.astype(w1_ref.dtype), w1_ref[...],
                     preferred_element_type=jnp.float32) + b1_ref[...]
        h1 = _gelu_exact(h1)
        x2 = jnp.dot(h1.astype(w2_ref.dtype), w2_ref[...],
                     preferred_element_type=jnp.float32) + b2_ref[...]
        out_ref[0] = _layernorm(x2 + x1, g2_ref[...], be2_ref[...])


def transformer_encoder_layer(x, attention_mask, params, *, num_heads,
                              scores_dtype=jnp.float32):
    B, S, E = x.shape
    d_model = params["wq"].shape[1]
    d_k = d_model // num_heads
    d_ff = params["w1"].shape[1]
    H = num_heads
    mm_dtype = jnp.bfloat16

    vmem_cap = _vmem_capacity_bytes()
    vmem_limit = int(max(32 << 20, min(vmem_cap - (8 << 20), 128 << 20)))

    # Pad the sequence to a lane multiple: all blocks (8,128)-aligned, scores store
    # lane-dense.  Padded key columns are masked out; padded query rows sliced off.
    Sp = ((S + LANE - 1) // LANE) * LANE
    TQ = 256 if (Sp % 256 == 0 and vmem_cap >= (96 << 20)) else 128
    n_qt = Sp // TQ

    x_p = jnp.pad(x.astype(jnp.float32), ((0, 0), (0, Sp - S), (0, 0)))
    m_p = jnp.pad(attention_mask.astype(jnp.float32), ((0, 0), (0, Sp - S)))
    mask3 = m_p.reshape(B, 1, Sp)

    # -------- kernel 1: fused QKV projection (bf16 operands, N-tiled) --------
    w_qkv = jnp.concatenate([params["wq"], params["wk"], params["wv"]],
                            axis=1).astype(mm_dtype)
    b_qkv = jnp.concatenate([params["bq"], params["bk"], params["bv"]],
                            axis=1).astype(jnp.float32)
    N3 = 3 * d_model

    R = B * Sp
    TR = _pick_row_tile(R)
    TN = _pick_col_tile(N3)
    x2d = x_p.reshape(R, E).astype(mm_dtype)

    qkv2d = pl.pallas_call(
        _qkv_proj_kernel,
        out_shape=jax.ShapeDtypeStruct((R, N3), mm_dtype),
        grid=(R // TR, N3 // TN),
        in_specs=[
            pl.BlockSpec((TR, E), lambda i, j: (i, 0)),
            pl.BlockSpec((E, TN), lambda i, j: (0, j)),
            pl.BlockSpec((1, TN), lambda i, j: (0, j)),
        ],
        out_specs=pl.BlockSpec((TR, TN), lambda i, j: (i, j)),
        compiler_params=pltpu.CompilerParams(
            dimension_semantics=("parallel", "parallel"),
            vmem_limit_bytes=vmem_limit),
        cost_estimate=pl.CostEstimate(
            flops=2 * R * E * N3,
            transcendentals=0,
            bytes_accessed=2 * (R * E + E * N3 + R * N3) + 4 * N3),
    )(x2d, w_qkv, b_qkv)

    # Head split outside the kernel (pure layout, handled by XLA; bf16 -> half traffic).
    # TODO(synk): emitting Q/K/V head-major directly from kernel 1 would remove these
    # transposes entirely, at the cost of narrow-N (d_k-wide) projection matmuls.
    qkv = qkv2d.reshape(B, Sp, 3, H, d_k)
    q = jnp.transpose(qkv[:, :, 0], (0, 2, 1, 3))   # (B, H, Sp, d_k) bf16
    k = jnp.transpose(qkv[:, :, 1], (0, 2, 1, 3))
    v = jnp.transpose(qkv[:, :, 2], (0, 2, 1, 3))

    # -------- kernel 2: attention + output proj + FFN + norms --------
    sc_bytes = jnp.dtype(scores_dtype).itemsize
    HC = _pick_head_chunk(H, TQ, Sp, d_k, sc_bytes,
                          budget=max(8 << 20, int(vmem_cap * 0.30)))
    n_hc = H // HC

    wo_h = params["wo"].reshape(H, d_k, E).astype(mm_dtype)   # per-head slices of Wo
    w1 = params["w1"].astype(mm_dtype)
    w2 = params["w2"].astype(mm_dtype)

    scale = 1.0 / math.sqrt(S)   # reference scales by sqrt(key_length) = original S

    def _run(single_buffer_consts):
        def const_spec(arr):
            imap = functools.partial(_const_index_map, ndim=arr.ndim)
            if single_buffer_consts:
                return pl.BlockSpec(arr.shape, imap, pipeline_mode=pl.Buffered(1))
            return pl.BlockSpec(arr.shape, imap)

        in_specs = [
            pl.BlockSpec((1, HC, TQ, d_k), lambda b, qi, hc: (b, hc, qi, 0)),
            pl.BlockSpec((1, HC, Sp, d_k), lambda b, qi, hc: (b, hc, 0, 0)),
            pl.BlockSpec((1, HC, Sp, d_k), lambda b, qi, hc: (b, hc, 0, 0)),
            pl.BlockSpec((1, TQ, E), lambda b, qi, hc: (b, qi, 0)),
            pl.BlockSpec((1, 1, Sp), lambda b, qi, hc: (b, 0, 0)),
            pl.BlockSpec((HC, d_k, E), lambda b, qi, hc: (hc, 0, 0)),
        ] + [const_spec(p) for p in
             (params["bo"], w1, params["b1"], w2, params["b2"],
              params["g1"], params["be1"], params["g2"], params["be2"])]

        out_specs = (
            pl.BlockSpec((1, TQ, E), lambda b, qi, hc: (b, qi, 0)),
            pl.BlockSpec((1, HC, TQ, Sp), lambda b, qi, hc: (b, hc, qi, 0)),
        )

        flops = B * (4 * Sp * Sp * d_model + 2 * Sp * d_model * E + 4 * Sp * E * d_ff)
        trans = B * (H * Sp * Sp + Sp * d_ff)
        bytes_accessed = (2 * 3 * B * H * Sp * d_k + 4 * 2 * B * Sp * E
                          + sc_bytes * B * H * Sp * Sp
                          + 2 * (d_model * E + 2 * E * d_ff))

        return pl.pallas_call(
            functools.partial(_attn_ffn_kernel, scale),
            out_shape=(
                jax.ShapeDtypeStruct((B, Sp, E), jnp.float32),
                jax.ShapeDtypeStruct((B, H, Sp, Sp), scores_dtype),
            ),
            grid=(B, n_qt, n_hc),
            in_specs=in_specs,
            out_specs=out_specs,
            scratch_shapes=[pltpu.VMEM((TQ, E), jnp.float32)],
            compiler_params=pltpu.CompilerParams(
                dimension_semantics=("parallel", "parallel", "arbitrary"),
                vmem_limit_bytes=vmem_limit),
            cost_estimate=pl.CostEstimate(
                flops=flops, transcendentals=trans, bytes_accessed=bytes_accessed),
        )(q, k, v, x_p, mask3, wo_h,
          params["bo"], w1, params["b1"], w2, params["b2"],
          params["g1"], params["be1"], params["g2"], params["be2"])

    try:
        out_p, sc_p = _run(True)
    except Exception:
        # pipeline_mode=pl.Buffered(1) not supported on this jax version:
        # fall back to default double-buffering (correctness unchanged).
        out_p, sc_p = _run(False)

    return out_p[:, :S, :], sc_p[:, :, :S, :S]


def _reference(x, mask, p, num_heads, mm_dtype=jnp.float32):
    """Pure-JAX reference mirroring the PyTorch forward pass.

    mm_dtype selects the matmul-operand precision (f32 = faithful PyTorch math,
    bf16 = the same operand quantization the kernel uses, f32 accumulation)."""
    B, S, E = x.shape
    d_model = p["wq"].shape[1]
    d_k = d_model // num_heads

    def mm(eq, a, b):
        return jnp.einsum(eq, a.astype(mm_dtype), b.astype(mm_dtype),
                          preferred_element_type=jnp.float32)

    def lin(a, w_, b_):
        return mm('bse,ef->bsf', a, w_) + b_[0]

    q = lin(x, p["wq"], p["bq"]).reshape(B, S, num_heads, d_k).transpose(0, 2, 1, 3)
    k = lin(x, p["wk"], p["bk"]).reshape(B, S, num_heads, d_k).transpose(0, 2, 1, 3)
    v = lin(x, p["wv"], p["bv"]).reshape(B, S, num_heads, d_k).transpose(0, 2, 1, 3)

    r = mm('bhqd,bhkd->bhqk', q, k)
    am = mask.astype(jnp.float32)[:, None, None, :]
    am = 1.0 - am
    am = jnp.where(am == 1.0, NEG_BIG, am)
    r = (r + am) / math.sqrt(S)
    scores = jax.nn.softmax(r, axis=-1)
    bl = mm('bhqk,bhkd->bhqd', scores, v).transpose(0, 2, 1, 3).reshape(B, S, d_model)
    bl = lin(bl, p["wo"], p["bo"])

    x1 = _layernorm(bl + x, p["g1"][0], p["be1"][0])
    h1 = _gelu_exact(lin(x1, p["w1"], p["b1"]))
    x2 = lin(h1, p["w2"], p["b2"])
    x2 = _layernorm(x2 + x1, p["g2"][0], p["be2"][0])
    return x2, scores


if __name__ == "__main__":
    B, S = 2, 8
    d_embed, d_model, num_heads, d_intermediate = 32, 32, 4, 64

    key = jax.random.PRNGKey(0)
    ks = jax.random.split(key, 16)

    def w(k, shape, fan_in):
        return jax.random.normal(k, shape, jnp.float32) / math.sqrt(fan_in)

    params = {
        "wq": w(ks[0], (d_embed, d_model), d_embed),
        "bq": w(ks[1], (1, d_model), d_embed),
        "wk": w(ks[2], (d_embed, d_model), d_embed),
        "bk": w(ks[3], (1, d_model), d_embed),
        "wv": w(ks[4], (d_embed, d_model), d_embed),
        "bv": w(ks[5], (1, d_model), d_embed),
        "wo": w(ks[6], (d_model, d_embed), d_model),
        "bo": w(ks[7], (1, d_embed), d_model),
        "w1": w(ks[8], (d_embed, d_intermediate), d_embed),
        "b1": w(ks[9], (1, d_intermediate), d_embed),
        "w2": w(ks[10], (d_intermediate, d_embed), d_intermediate),
        "b2": w(ks[11], (1, d_embed), d_intermediate),
        "g1": jnp.ones((1, d_embed), jnp.float32),
        "be1": jnp.zeros((1, d_embed), jnp.float32),
        "g2": jnp.ones((1, d_embed), jnp.float32),
        "be2": jnp.zeros((1, d_embed), jnp.float32),
    }

    x = jax.random.normal(ks[12], (B, S, d_embed), jnp.float32)
    # binary attention mask, make sure a few key positions are masked out
    mask = (jax.random.uniform(ks[13], (B, S)) > 0.25).astype(jnp.float32)
    mask = mask.at[:, 0].set(1.0)

    out, scores = transformer_encoder_layer(x, mask, params, num_heads=num_heads)
    out = jax.block_until_ready(out)
    scores = jax.block_until_ready(scores)

    # (1) implementation check: reference using the same bf16 matmul-operand
    #     quantization / f32 accumulation as the kernel -> tight agreement expected.
    ref_out_b, ref_sc_b = _reference(x, mask, params, num_heads, mm_dtype=jnp.bfloat16)
    np.testing.assert_allclose(np.asarray(out), np.asarray(ref_out_b), rtol=2e-2, atol=2e-2)
    np.testing.assert_allclose(np.asarray(scores), np.asarray(ref_sc_b), rtol=2e-2, atol=2e-3)

    # (2) semantic check: full-f32 reference faithful to the PyTorch module
    #     (looser tolerance, accounts for bf16 MXU operands in the kernel).
    ref_out, ref_sc = _reference(x, mask, params, num_heads, mm_dtype=jnp.float32)
    np.testing.assert_allclose(np.asarray(out), np.asarray(ref_out), rtol=8e-2, atol=8e-2)
    np.testing.assert_allclose(np.asarray(scores), np.asarray(ref_sc), rtol=8e-2, atol=8e-3)

    print("KERNEL_OK")
</pallas_src>

<mosaic_0001>
module attributes {stable_mosaic.version = 11 : i64} {
  func.func @_qkv_proj_kernel(%arg0: i32, %arg1: i32, %arg2: memref<256x32xbf16, #tpu.memory_space<vmem>>, %arg3: memref<32x96xbf16, #tpu.memory_space<vmem>>, %arg4: memref<1x96xf32, #tpu.memory_space<vmem>>, %arg5: memref<256x96xbf16, #tpu.memory_space<vmem>>) attributes {dimension_semantics = [#tpu.dimension_semantics<parallel>, #tpu.dimension_semantics<parallel>], iteration_bounds = array<i64: 1, 1>, scalar_prefetch = 0 : i64, scratch_operands = 0 : i64, tpu.core_type = #tpu.core_type<tc>, window_params = [{transform_indices = @transform_0, window_bounds = array<i64: 256, 32>}, {transform_indices = @transform_1, window_bounds = array<i64: 32, 96>}, {transform_indices = @transform_2, window_bounds = array<i64: 1, 96>}, {transform_indices = @transform_3, window_bounds = array<i64: 256, 96>}]} {
    %c0 = arith.constant 0 : index
    %c0_0 = arith.constant 0 : index
    %0 = vector.load %arg2[%c0, %c0_0] : memref<256x32xbf16, #tpu.memory_space<vmem>>, vector<256x32xbf16>
    %c0_1 = arith.constant 0 : index
    %c0_2 = arith.constant 0 : index
    %1 = vector.load %arg3[%c0_1, %c0_2] : memref<32x96xbf16, #tpu.memory_space<vmem>>, vector<32x96xbf16>
    %cst = arith.constant dense<0.000000e+00> : vector<256x96xf32>
    %2 = tpu.matmul %0, %1, %cst {dimension_numbers = #tpu.dot_dimension_numbers<[1], [0], [0], [1], [0, 0, 1, 1], [], []>} : vector<256x32xbf16>, vector<32x96xbf16>, vector<256x96xf32> -> vector<256x96xf32>
    %c0_3 = arith.constant 0 : index
    %c0_4 = arith.constant 0 : index
    %3 = vector.load %arg4[%c0_3, %c0_4] : memref<1x96xf32, #tpu.memory_space<vmem>>, vector<1x96xf32>
    %4 = vector.broadcast %3 : vector<1x96xf32> to vector<256x96xf32>
    %5 = arith.addf %2, %4 : vector<256x96xf32>
    %6 = arith.truncf %5 : vector<256x96xf32> to vector<256x96xbf16>
    %c0_5 = arith.constant 0 : index
    %c0_6 = arith.constant 0 : index
    %7 = vector.load %arg5[%c0_5, %c0_6] : memref<256x96xbf16, #tpu.memory_space<vmem>>, vector<256x96xbf16>
    tpu.vector_store %arg5[%c0_5, %c0_6], %6 {strides = array<i32>} : memref<256x96xbf16, #tpu.memory_space<vmem>>, vector<256x96xbf16>,
    return
  }
  func.func @transform_0(%arg0: i32, %arg1: i32) -> (i32, i32) {
    %c0_i32 = arith.constant 0 : i32
    %c0_i32_0 = arith.constant 0 : i32
    return %arg0, %c0_i32 : i32, i32
  }
  func.func @transform_1(%arg0: i32, %arg1: i32) -> (i32, i32) {
    %c0_i32 = arith.constant 0 : i32
    %c0_i32_0 = arith.constant 0 : i32
    return %c0_i32, %arg1 : i32, i32
  }
  func.func @transform_2(%arg0: i32, %arg1: i32) -> (i32, i32) {
    %c0_i32 = arith.constant 0 : i32
    %c0_i32_0 = arith.constant 0 : i32
    return %c0_i32, %arg1 : i32, i32
  }
  func.func @transform_3(%arg0: i32, %arg1: i32) -> (i32, i32) {
    %c0_i32 = arith.constant 0 : i32
    return %arg0, %arg1 : i32, i32
  }
}

</mosaic_0001>

<bundles_post_ra>
// kernel: tpu_custom_call.1
= control target key start
LH: loop header
LB: loop body
LE: loop exit
PB: predicated region body
PF: predicated region fallthrough
CT: control target
= control target key end

     0   :  { %vm150_vm0 = vcmask 261120   ;;  %vm488_vm1 = vcmask 781312   ;;  %s955_s1 = inlined_call_operand.vmem [shape: bf16[32,96], index: 1, kind: input, shape index: {}]   ;;  %s956_s0 = inlined_call_operand.vmem [shape: bf16[256,32], index: 0, kind: input, shape index: {}]   ;;  %s957_s2 = inlined_call_operand.vmem [shape: f32[1,96], index: 2, kind: input, shape index: {}]   ;;  %s958_s3 = inlined_call_operand.vmem [shape: bf16[256,96], index: 3, kind: output, shape index: {}]  }
   0x1   :  { %v682_v0 = vld [vmem:[%s955_s1] sm:$0xff]   ;;  %v683_v1 = vld [vmem:[%s955_s1 + $0x8] sm:$0xff]   ;;  %v688_v6 = vld [vmem:[%s956_s0 + $0x10] sm:$0xff]  }
   0x2   :  { %642 = vmatprep.subr.bf16.mxu0 %v682_v0  ;;  %678 = vmatprep.subr.bf16.mxu1 %v682_v0  ;;  %v684_v2 = vld [vmem:[%s956_s0] sm:$0xff]   ;;  %v686_v4 = vld [vmem:[%s956_s0 + $0x8] sm:$0xff]   ;;  %v689_v7 = vld [vmem:[%s956_s0 + $0x50] sm:$0xff]  }
   0x3   :  { %643 = vmatpush3.bf16.msra.mxu0 %v682_v0  ;;  %680 = vmatpush3.bf16.msra.mxu1 %v682_v0  ;;  %v685_v3 = vld [vmem:[%s956_s0 + $0x40] sm:$0xff]   ;;  %v687_v5 = vld [vmem:[%s956_s0 + $0x48] sm:$0xff]   ;;  %v690_v8 = vld [vmem:[%s956_s0 + $0x18] sm:$0xff]  }
   0x4   :  { %644 = vmatprep.subr.bf16.mxu0 %v683_v1  ;;  %679 = vmatprep.subr.bf16.mxu1 %v683_v1  ;;  %v691_v9 = vld [vmem:[%s956_s0 + $0x58] sm:$0xff]   ;;  %v692_v10 = vld [vmem:[%s956_s0 + $0x20] sm:$0xff]   ;;  %v694_v12 = vld [vmem:[%s956_s0 + $0x28] sm:$0xff]  }
   0x5   :  { %646 = vmatprep.mubr.msk.bf16.mxu0 %vm150_vm0, %v684_v2  ;;  %662 = vmatprep.mubr.msk.bf16.mxu1 %vm150_vm0, %v685_v3  ;;  %v693_v11 = vld [vmem:[%s956_s0 + $0x60] sm:$0xff]   ;;  %v695_v13 = vld [vmem:[%s956_s0 + $0x68] sm:$0xff]   ;;  %v696_v14 = vld [vmem:[%s956_s0 + $0x30] sm:$0xff]  }
   0x6   :  { %v697_v15 = vld [vmem:[%s956_s0 + $0x70] sm:$0xff]   ;;  %v698_v16 = vld [vmem:[%s956_s0 + $0x38] sm:$0xff]   ;;  %v793_v18 = vld [vmem:[%s957_s2] ss:$0 sm:$0xff] }
   0x7   :  { %645 = vmatpush3.bf16.msra.mxu0 %v683_v1  ;;  %681 = vmatpush3.bf16.msra.mxu1 %v683_v1  ;;  %v699_v17 = vld [vmem:[%s956_s0 + $0x78] sm:$0xff]  }
   0xa   :  { %647 = vmatmul.mubr.msk.bf16.vlgmr.msra.gmra.mrb[0].mxu0 %vm150_vm0, %v686_v4  ;;  %663 = vmatmul.mubr.msk.bf16.vlgmr.msra.gmra.mrb[0].mxu1 %vm150_vm0, %v687_v5 }
   0xb   :  { %650 = vmatprep.mubr.msk.bf16.mxu0 %vm150_vm0, %v688_v6  ;;  %666 = vmatprep.mubr.msk.bf16.mxu1 %vm150_vm0, %v689_v7 }
  0x12   :  { %651 = vmatmul.mubr.msk.bf16.gmra.mrb[4].mxu0 %vm150_vm0, %v690_v8  ;;  %667 = vmatmul.mubr.msk.bf16.gmra.mrb[4].mxu1 %vm150_vm0, %v691_v9 }
  0x13   :  { %654 = vmatprep.mubr.msk.bf16.mxu0 %vm150_vm0, %v692_v10  ;;  %670 = vmatprep.mubr.msk.bf16.mxu1 %vm150_vm0, %v693_v11 }
  0x1a   :  { %655 = vmatmul.mubr.msk.bf16.gmra.mrb[8].mxu0 %vm150_vm0, %v694_v12  ;;  %671 = vmatmul.mubr.msk.bf16.gmra.mrb[8].mxu1 %vm150_vm0, %v695_v13 }
  0x1b   :  { %658 = vmatprep.mubr.msk.bf16.mxu0 %vm150_vm0, %v696_v14  ;;  %674 = vmatprep.mubr.msk.bf16.mxu1 %vm150_vm0, %v697_v15 }
  0x22   :  { %659 = vmatmul.mubr.msk.bf16.gmra.mrb[12].mxu0 %vm150_vm0, %v698_v16  ;;  %675 = vmatmul.mubr.msk.bf16.gmra.mrb[12].mxu1 %vm150_vm0, %v699_v17 }
  0xdd   :  { %v648_v19 = vpop.f32.mrb[0].mxu0  ;;  %v664_v20 = vpop.f32.mrb[0].mxu1 }
  0xde   :  { %v242_v21 = vadd.f32 %v648_v19, %v793_v18  ;;  %v306_v22 = vadd.f32 %v664_v20, %v793_v18  ;;  %v233_v23 = vpop.f32.mrb[1].mxu0  ;;  %v297_v24 = vpop.f32.mrb[1].mxu1 }
  0xdf   :  { %v234_v25 = vadd.f32 %v793_v18, %v233_v23  ;;  %v298_v26 = vadd.f32 %v793_v18, %v297_v24  ;;  %v649_v27 = vpop.f32.mrb[2].mxu0  ;;  %v665_v28 = vpop.f32.mrb[2].mxu1 }
  0xe0   :  { %v594_v29 = vpack.c.bf16 %v242_v21, %v242_v21  ;;  %v610_v30 = vpack.c.bf16 %v306_v22, %v306_v22  ;;  %v245_v31 = vadd.f32 %v649_v27, %v793_v18  ;;  %v309_v32 = vadd.f32 %v665_v28, %v793_v18  ;;  %v236_v33 = vpop.f32.mrb[3].mxu0  ;;  %v300_v34 = vpop.f32.mrb[3].mxu1 }
  0xe1   :  { %v592_v35 = vpack.c.bf16 %v234_v25, %v234_v25  ;;  %v608_v36 = vpack.c.bf16 %v298_v26, %v298_v26  ;;  %v237_v37 = vadd.f32 %v793_v18, %v236_v33  ;;  %v301_v38 = vadd.f32 %v793_v18, %v300_v34 }
  0xe2   :  { %491 = vst.msk [vmem:[%s958_s3 + $0x8] sm:$0xf] %vm488_vm1, %v594_v29  ;;  %507 = vst.msk [vmem:[%s958_s3 + $0x48] sm:$0xf] %vm488_vm1, %v610_v30  ;;  %v595_v39 = vpack.c.bf16 %v245_v31, %v245_v31  ;;  %v611_v40 = vpack.c.bf16 %v309_v32, %v309_v32 }
  0xe3   :  { %489 = vst.msk [vmem:[%s958_s3] sm:$0xf] %vm488_vm1, %v592_v35  ;;  %505 = vst.msk [vmem:[%s958_s3 + $0x40] sm:$0xf] %vm488_vm1, %v608_v36  ;;  %v593_v41 = vpack.c.bf16 %v237_v37, %v237_v37  ;;  %v609_v42 = vpack.c.bf16 %v301_v38, %v301_v38 }
  0xe4   :  { %492 = vst.msk [vmem:[%s958_s3 + $0xc] sm:$0xf] %vm488_vm1, %v595_v39  ;;  %508 = vst.msk [vmem:[%s958_s3 + $0x4c] sm:$0xf] %vm488_vm1, %v611_v40 }
  0xe5   :  { %490 = vst.msk [vmem:[%s958_s3 + $0x4] sm:$0xf] %vm488_vm1, %v593_v41  ;;  %506 = vst.msk [vmem:[%s958_s3 + $0x44] sm:$0xf] %vm488_vm1, %v609_v42  ;;  %v652_v43 = vpop.f32.mrb[4].mxu0  ;;  %v668_v44 = vpop.f32.mrb[4].mxu1 }
  0xe6   :  { %v258_v45 = vadd.f32 %v652_v43, %v793_v18  ;;  %v322_v46 = vadd.f32 %v668_v44, %v793_v18  ;;  %v249_v47 = vpop.f32.mrb[5].mxu0  ;;  %v313_v48 = vpop.f32.mrb[5].mxu1 }
  0xe7   :  { %v250_v49 = vadd.f32 %v793_v18, %v249_v47  ;;  %v314_v50 = vadd.f32 %v793_v18, %v313_v48  ;;  %v653_v51 = vpop.f32.mrb[6].mxu0  ;;  %v669_v52 = vpop.f32.mrb[6].mxu1 }
  0xe8   :  { %v598_v53 = vpack.c.bf16 %v258_v45, %v258_v45  ;;  %v614_v54 = vpack.c.bf16 %v322_v46, %v322_v46  ;;  %v261_v55 = vadd.f32 %v653_v51, %v793_v18  ;;  %v325_v56 = vadd.f32 %v669_v52, %v793_v18  ;;  %v252_v57 = vpop.f32.mrb[7].mxu0  ;;  %v316_v58 = vpop.f32.mrb[7].mxu1 }
  0xe9   :  { %v596_v59 = vpack.c.bf16 %v250_v49, %v250_v49  ;;  %v612_v60 = vpack.c.bf16 %v314_v50, %v314_v50  ;;  %v253_v61 = vadd.f32 %v793_v18, %v252_v57  ;;  %v317_v62 = vadd.f32 %v793_v18, %v316_v58 }
  0xea   :  { %495 = vst.msk [vmem:[%s958_s3 + $0x18] sm:$0xf] %vm488_vm1, %v598_v53  ;;  %511 = vst.msk [vmem:[%s958_s3 + $0x58] sm:$0xf] %vm488_vm1, %v614_v54  ;;  %v599_v63 = vpack.c.bf16 %v261_v55, %v261_v55  ;;  %v615_v0 = vpack.c.bf16 %v325_v56, %v325_v56 }
  0xeb   :  { %493 = vst.msk [vmem:[%s958_s3 + $0x10] sm:$0xf] %vm488_vm1, %v596_v59  ;;  %509 = vst.msk [vmem:[%s958_s3 + $0x50] sm:$0xf] %vm488_vm1, %v612_v60  ;;  %v597_v1 = vpack.c.bf16 %v253_v61, %v253_v61  ;;  %v613_v2 = vpack.c.bf16 %v317_v62, %v317_v62 }
  0xec   :  { %496 = vst.msk [vmem:[%s958_s3 + $0x1c] sm:$0xf] %vm488_vm1, %v599_v63  ;;  %512 = vst.msk [vmem:[%s958_s3 + $0x5c] sm:$0xf] %vm488_vm1, %v615_v0 }
  0xed   :  { %494 = vst.msk [vmem:[%s958_s3 + $0x14] sm:$0xf] %vm488_vm1, %v597_v1  ;;  %510 = vst.msk [vmem:[%s958_s3 + $0x54] sm:$0xf] %vm488_vm1, %v613_v2  ;;  %v656_v3 = vpop.f32.mrb[8].mxu0  ;;  %v672_v4 = vpop.f32.mrb[8].mxu1 }
  0xee   :  { %v274_v5 = vadd.f32 %v656_v3, %v793_v18  ;;  %v338_v6 = vadd.f32 %v672_v4, %v793_v18  ;;  %v265_v7 = vpop.f32.mrb[9].mxu0  ;;  %v329_v8 = vpop.f32.mrb[9].mxu1 }
  0xef   :  { %v266_v9 = vadd.f32 %v793_v18, %v265_v7  ;;  %v330_v10 = vadd.f32 %v793_v18, %v329_v8  ;;  %v657_v11 = vpop.f32.mrb[10].mxu0  ;;  %v673_v12 = vpop.f32.mrb[10].mxu1 }
  0xf0   :  { %v602_v13 = vpack.c.bf16 %v274_v5, %v274_v5  ;;  %v618_v14 = vpack.c.bf16 %v338_v6, %v338_v6  ;;  %v277_v15 = vadd.f32 %v657_v11, %v793_v18  ;;  %v341_v16 = vadd.f32 %v673_v12, %v793_v18  ;;  %v268_v17 = vpop.f32.mrb[11].mxu0  ;;  %v332_v19 = vpop.f32.mrb[11].mxu1 }
  0xf1   :  { %v600_v20 = vpack.c.bf16 %v266_v9, %v266_v9  ;;  %v616_v21 = vpack.c.bf16 %v330_v10, %v330_v10  ;;  %v269_v22 = vadd.f32 %v793_v18, %v268_v17  ;;  %v333_v23 = vadd.f32 %v793_v18, %v332_v19 }
  0xf2   :  { %499 = vst.msk [vmem:[%s958_s3 + $0x28] sm:$0xf] %vm488_vm1, %v602_v13  ;;  %515 = vst.msk [vmem:[%s958_s3 + $0x68] sm:$0xf] %vm488_vm1, %v618_v14  ;;  %v603_v24 = vpack.c.bf16 %v277_v15, %v277_v15  ;;  %v619_v25 = vpack.c.bf16 %v341_v16, %v341_v16 }
  0xf3   :  { %497 = vst.msk [vmem:[%s958_s3 + $0x20] sm:$0xf] %vm488_vm1, %v600_v20  ;;  %513 = vst.msk [vmem:[%s958_s3 + $0x60] sm:$0xf] %vm488_vm1, %v616_v21  ;;  %v601_v26 = vpack.c.bf16 %v269_v22, %v269_v22  ;;  %v617_v27 = vpack.c.bf16 %v333_v23, %v333_v23 }
  0xf4   :  { %500 = vst.msk [vmem:[%s958_s3 + $0x2c] sm:$0xf] %vm488_vm1, %v603_v24  ;;  %516 = vst.msk [vmem:[%s958_s3 + $0x6c] sm:$0xf] %vm488_vm1, %v619_v25 }
  0xf5   :  { %498 = vst.msk [vmem:[%s958_s3 + $0x24] sm:$0xf] %vm488_vm1, %v601_v26  ;;  %514 = vst.msk [vmem:[%s958_s3 + $0x64] sm:$0xf] %vm488_vm1, %v617_v27  ;;  %v660_v28 = vpop.f32.mrb[12].mxu0  ;;  %v676_v29 = vpop.f32.mrb[12].mxu1 }
  0xf6   :  { %v290_v30 = vadd.f32 %v660_v28, %v793_v18  ;;  %v354_v31 = vadd.f32 %v676_v29, %v793_v18  ;;  %v281_v32 = vpop.f32.mrb[13].mxu0  ;;  %v345_v33 = vpop.f32.mrb[13].mxu1 }
  0xf7   :  { %v282_v34 = vadd.f32 %v793_v18, %v281_v32  ;;  %v346_v35 = vadd.f32 %v793_v18, %v345_v33  ;;  %v661_v36 = vpop.f32.mrb[14].mxu0  ;;  %v677_v37 = vpop.f32.mrb[14].mxu1 }
  0xf8   :  { %v606_v38 = vpack.c.bf16 %v290_v30, %v290_v30  ;;  %v622_v39 = vpack.c.bf16 %v354_v31, %v354_v31  ;;  %v293_v40 = vadd.f32 %v661_v36, %v793_v18  ;;  %v357_v41 = vadd.f32 %v677_v37, %v793_v18  ;;  %v284_v42 = vpop.f32.mrb[15].mxu0  ;;  %v348_v43 = vpop.f32.mrb[15].mxu1 }
  0xf9   :  { %v604_v44 = vpack.c.bf16 %v282_v34, %v282_v34  ;;  %v620_v45 = vpack.c.bf16 %v346_v35, %v346_v35  ;;  %v285_v46 = vadd.f32 %v793_v18, %v284_v42  ;;  %v349_v47 = vadd.f32 %v793_v18, %v348_v43 }
  0xfa   :  { %503 = vst.msk [vmem:[%s958_s3 + $0x38] sm:$0xf] %vm488_vm1, %v606_v38  ;;  %519 = vst.msk [vmem:[%s958_s3 + $0x78] sm:$0xf] %vm488_vm1, %v622_v39  ;;  %v607_v48 = vpack.c.bf16 %v293_v40, %v293_v40  ;;  %v623_v49 = vpack.c.bf16 %v357_v41, %v357_v41 }
  0xfb   :  { %501 = vst.msk [vmem:[%s958_s3 + $0x30] sm:$0xf] %vm488_vm1, %v604_v44  ;;  %517 = vst.msk [vmem:[%s958_s3 + $0x70] sm:$0xf] %vm488_vm1, %v620_v45  ;;  %v605_v18 = vpack.c.bf16 %v285_v46, %v285_v46  ;;  %v621_v50 = vpack.c.bf16 %v349_v47, %v349_v47 }
  0xfc   :  { %504 = vst.msk [vmem:[%s958_s3 + $0x3c] sm:$0xf] %vm488_vm1, %v607_v48  ;;  %520 = vst.msk [vmem:[%s958_s3 + $0x7c] sm:$0xf] %vm488_vm1, %v623_v49 }
  0xfd   :  { %502 = vst.msk [vmem:[%s958_s3 + $0x34] sm:$0xf] %vm488_vm1, %v605_v18  ;;  %518 = vst.msk [vmem:[%s958_s3 + $0x74] sm:$0xf] %vm488_vm1, %v621_v50 }

</bundles_post_ra>
